<compile_context>
chip_gen: v6e
topology: v6e:2x2x1
jax: 0.10.0
libtpu: 0.0.40
codegen_flags: <defaults>
</compile_context>

<pallas_src>
import math
from functools import partial

import jax
import jax.numpy as jnp
from jax.experimental import pallas as pl
from jax.experimental.pallas import tpu as pltpu

LANE = 128     # f32 lane width (last dim)
SUBLANE = 8    # f32 sublane width (second-to-last dim)


def _round_up(n, m):
    return ((n + m - 1) // m) * m


def _mlp_kernel(x_ref, w1_ref, b1_ref, w2_ref, b2_ref, w3_ref, b3_ref, out_ref):
    """Fused 3-layer MLP on one batch tile; weights are resident/replicated.

    Padded lanes of the (pre-noised, zero-padded) weights/biases are exact
    zeros, so padded hidden lanes stay zero through the relu chain and no
    masking is required.
    """
    h = jnp.dot(x_ref[...], w1_ref[...], preferred_element_type=jnp.float32) + b1_ref[...]
    h = jnp.maximum(h, 0.0)
    h = jnp.dot(h, w2_ref[...], preferred_element_type=jnp.float32) + b2_ref[...]
    h = jnp.maximum(h, 0.0)
    out_ref[...] = (jnp.dot(h, w3_ref[...], preferred_element_type=jnp.float32)
                    + b3_ref[...])


def _effective_params(params, key, sigma):
    """W_eff = W + sigma*eps, b_eff = b + sigma*eps on the real (unpadded)
    shapes — mirrors NoisyLinear.forward's epsilon_*.normal_() per call."""
    keys = jax.random.split(key, 6)
    eff = {}
    for i, name in enumerate(("fc1", "fc2", "fc3")):
        w, b = params[name]
        kw, kb = keys[2 * i], keys[2 * i + 1]
        w_eff = w + sigma * jax.random.normal(kw, w.shape, jnp.float32)
        b_eff = b + sigma * jax.random.normal(kb, b.shape, jnp.float32)
        eff[name] = (w_eff, b_eff)
    return eff


@partial(jax.jit, static_argnames=("batch_tile",))
def noisy_dqn_forward(x, params, key, sigma, *, batch_tile=512):
    """Fused NoisyLinear-MLP forward.

    x:      (batch, input_dim) float32
    params: {"fc1": (w, b), "fc2": (w, b), "fc3": (w, b)} in PyTorch layout
            (w: (out, in), b: (out,)).
    key:    jax PRNG key — fresh noise per forward call.
    sigma:  sigma_init of the module (traced scalar; 0.0 disables noise).
    """
    batch, in_dim = x.shape
    w1, b1 = params["fc1"]
    w2, b2 = params["fc2"]
    w3, b3 = params["fc3"]
    assert in_dim == w1.shape[1]
    h1_dim, h2_dim, out_dim = w1.shape[0], w2.shape[0], w3.shape[0]

    h1_p = _round_up(h1_dim, LANE)
    h2_p = _round_up(h2_dim, LANE)
    out_p = _round_up(out_dim, LANE)

    # Batch tiling: multiple of 8 sublanes; aim for >= 2 grid steps so v7x's
    # second TensorCore gets work, capped at batch_tile (per-buffer footprint
    # at 512 rows is well under the scoped-VMEM default on every generation).
    batch_p8 = _round_up(batch, SUBLANE)
    half = _round_up((batch_p8 + 1) // 2, SUBLANE)
    b_tile = max(SUBLANE, min(batch_tile, half))
    batch_p = _round_up(batch_p8, b_tile)
    n_tiles = batch_p // b_tile

    f32 = jnp.float32

    # Noise applied on real shapes in the wrapper (fused under jit), then
    # transposed + zero-padded -> padded lanes are exactly zero.
    eff = _effective_params(params, key, sigma)
    w1e, b1e = eff["fc1"]
    w2e, b2e = eff["fc2"]
    w3e, b3e = eff["fc3"]

    w1_pad = jnp.pad(w1e.T.astype(f32), ((0, 0), (0, h1_p - h1_dim)))
    b1_pad = jnp.pad(b1e.astype(f32)[None, :], ((0, 0), (0, h1_p - h1_dim)))
    w2_pad = jnp.pad(w2e.T.astype(f32), ((0, h1_p - h1_dim), (0, h2_p - h2_dim)))
    b2_pad = jnp.pad(b2e.astype(f32)[None, :], ((0, 0), (0, h2_p - h2_dim)))
    w3_pad = jnp.pad(w3e.T.astype(f32), ((0, h2_p - h2_dim), (0, out_p - out_dim)))
    b3_pad = jnp.pad(b3e.astype(f32)[None, :], ((0, 0), (0, out_p - out_dim)))

    # Only the batch dim of x is padded; the lane dim stays at in_dim
    # (block last dim == full array dim, allowed by the (8,128) rule).
    x_pad = jnp.pad(x.astype(f32), ((0, batch_p - batch), (0, 0)))

    flops = 2 * batch_p * (in_dim * h1_p + h1_p * h2_p + h2_p * out_p)
    bytes_accessed = 4 * (batch_p * in_dim
                          + in_dim * h1_p + h1_p
                          + h1_p * h2_p + h2_p
                          + h2_p * out_p + out_p
                          + batch_p * out_p)

    y_pad = pl.pallas_call(
        _mlp_kernel,
        out_shape=jax.ShapeDtypeStruct((batch_p, out_p), jnp.float32),
        grid=(n_tiles,),
        in_specs=[
            pl.BlockSpec((b_tile, in_dim), lambda i: (i, 0)),    # x tile
            pl.BlockSpec((in_dim, h1_p), lambda i: (0, 0)),      # w1_eff (resident)
            pl.BlockSpec((1, h1_p), lambda i: (0, 0)),           # b1_eff
            pl.BlockSpec((h1_p, h2_p), lambda i: (0, 0)),        # w2_eff
            pl.BlockSpec((1, h2_p), lambda i: (0, 0)),           # b2_eff
            pl.BlockSpec((h2_p, out_p), lambda i: (0, 0)),       # w3_eff
            pl.BlockSpec((1, out_p), lambda i: (0, 0)),          # b3_eff
        ],
        out_specs=pl.BlockSpec((b_tile, out_p), lambda i: (i, 0)),
        compiler_params=pltpu.CompilerParams(
            dimension_semantics=("parallel",)),                   # megacore on v7x
        cost_estimate=pl.CostEstimate(
            flops=flops, transcendentals=0, bytes_accessed=bytes_accessed),
    )(x_pad, w1_pad, b1_pad, w2_pad, b2_pad, w3_pad, b3_pad)

    return y_pad[:batch, :out_dim]


# ----------------------------------------------------------------------------
# Parameter init (replicates NoisyLinear.init_parameters: uniform +-sqrt(3/in)).
# sigma_weight / sigma_bias are constant (= sigma_init) so they are not stored.
# ----------------------------------------------------------------------------
def make_params(key, input_dim, output_dim, hidden=64):
    def init_linear(k, n_in, n_out):
        kw, kb = jax.random.split(k)
        std = math.sqrt(3.0 / n_in)
        w = jax.random.uniform(kw, (n_out, n_in), jnp.float32, -std, std)
        b = jax.random.uniform(kb, (n_out,), jnp.float32, -std, std)
        return w, b

    k1, k2, k3 = jax.random.split(key, 3)
    return {
        "fc1": init_linear(k1, input_dim, hidden),
        "fc2": init_linear(k2, hidden, hidden),
        "fc3": init_linear(k3, hidden, output_dim),
    }


def reference_forward_noiseless(x, params):
    """Pure-JAX reference of the MLP with the given (possibly effective) params."""
    w1, b1 = params["fc1"]
    w2, b2 = params["fc2"]
    w3, b3 = params["fc3"]
    h = jnp.maximum(x @ w1.T + b1, 0.0)
    h = jnp.maximum(h @ w2.T + b2, 0.0)
    return h @ w3.T + b3


def reference_forward_noisy(x, params, key, sigma):
    """Pure-JAX reference with the exact same noise draw as the kernel wrapper."""
    return reference_forward_noiseless(x, _effective_params(params, key, sigma))


if __name__ == "__main__":
    batch, input_dim, output_dim = 2, 16, 4
    key = jax.random.PRNGKey(0)
    k_x, k_p, k_n = jax.random.split(key, 3)

    x = jax.random.normal(k_x, (batch, input_dim), jnp.float32)
    params = make_params(k_p, input_dim, output_dim)

    # 1) sigma = 0: noise has no effect -> must match the plain MLP.
    out0 = jax.block_until_ready(noisy_dqn_forward(x, params, k_n, 0.0))
    ref0 = reference_forward_noiseless(x, params)
    assert out0.shape == (batch, output_dim)
    assert bool(jnp.allclose(out0, ref0, atol=1e-4, rtol=1e-4))

    # 2) sigma = 0.017: noise applied, deterministic per key, exact match to a
    #    pure-JAX reference that uses the identical noise draw.
    out_a = jax.block_until_ready(noisy_dqn_forward(x, params, k_n, 0.017))
    out_b = jax.block_until_ready(noisy_dqn_forward(x, params, k_n, 0.017))
    ref_n = reference_forward_noisy(x, params, k_n, 0.017)
    assert out_a.shape == (batch, output_dim)
    assert bool(jnp.all(jnp.isfinite(out_a)))
    assert bool(jnp.array_equal(out_a, out_b))                    # same key -> same noise
    assert bool(jnp.allclose(out_a, ref_n, atol=1e-4, rtol=1e-4))  # matches reference
    assert not bool(jnp.allclose(out_a, ref0, atol=1e-6))          # noise actually applied

    print("KERNEL_OK")
</pallas_src>

<mosaic_0001>
module attributes {stable_mosaic.version = 11 : i64} {
  func.func @_mlp_kernel(%arg0: i32, %arg1: memref<8x16xf32, #tpu.memory_space<vmem>>, %arg2: memref<16x128xf32, #tpu.memory_space<vmem>>, %arg3: memref<1x128xf32, #tpu.memory_space<vmem>>, %arg4: memref<128x128xf32, #tpu.memory_space<vmem>>, %arg5: memref<1x128xf32, #tpu.memory_space<vmem>>, %arg6: memref<128x128xf32, #tpu.memory_space<vmem>>, %arg7: memref<1x128xf32, #tpu.memory_space<vmem>>, %arg8: memref<8x128xf32, #tpu.memory_space<vmem>>) attributes {dimension_semantics = [#tpu.dimension_semantics<parallel>], iteration_bounds = array<i64: 1>, scalar_prefetch = 0 : i64, scratch_operands = 0 : i64, tpu.core_type = #tpu.core_type<tc>, window_params = [{transform_indices = @transform_0, window_bounds = array<i64: 8, 16>}, {pipeline_mode = #tpu.pipeline_mode<synchronous>, transform_indices = @transform_1, window_bounds = array<i64: 16, 128>}, {pipeline_mode = #tpu.pipeline_mode<synchronous>, transform_indices = @transform_2, window_bounds = array<i64: 1, 128>}, {pipeline_mode = #tpu.pipeline_mode<synchronous>, transform_indices = @transform_3, window_bounds = array<i64: 128, 128>}, {pipeline_mode = #tpu.pipeline_mode<synchronous>, transform_indices = @transform_4, window_bounds = array<i64: 1, 128>}, {pipeline_mode = #tpu.pipeline_mode<synchronous>, transform_indices = @transform_5, window_bounds = array<i64: 128, 128>}, {pipeline_mode = #tpu.pipeline_mode<synchronous>, transform_indices = @transform_6, window_bounds = array<i64: 1, 128>}, {transform_indices = @transform_7, window_bounds = array<i64: 8, 128>}]} {
    %c0 = arith.constant 0 : index
    %c0_0 = arith.constant 0 : index
    %0 = vector.load %arg1[%c0, %c0_0] : memref<8x16xf32, #tpu.memory_space<vmem>>, vector<8x16xf32>
    %c0_1 = arith.constant 0 : index
    %c0_2 = arith.constant 0 : index
    %1 = vector.load %arg2[%c0_1, %c0_2] : memref<16x128xf32, #tpu.memory_space<vmem>>, vector<16x128xf32>
    %cst = arith.constant dense<0.000000e+00> : vector<8x128xf32>
    %2 = tpu.matmul %0, %1, %cst {dimension_numbers = #tpu.dot_dimension_numbers<[1], [0], [0], [1], [0, 0, 1, 1], [], []>} : vector<8x16xf32>, vector<16x128xf32>, vector<8x128xf32> -> vector<8x128xf32>
    %c0_3 = arith.constant 0 : index
    %c0_4 = arith.constant 0 : index
    %3 = vector.load %arg3[%c0_3, %c0_4] : memref<1x128xf32, #tpu.memory_space<vmem>>, vector<1x128xf32>
    %4 = vector.broadcast %3 : vector<1x128xf32> to vector<8x128xf32>
    %5 = arith.addf %2, %4 : vector<8x128xf32>
    %cst_5 = arith.constant 0.000000e+00 : f32
    %6 = vector.broadcast %cst_5 : f32 to vector<8x128xf32>
    %7 = arith.maximumf %5, %6 : vector<8x128xf32>
    %c0_6 = arith.constant 0 : index
    %c0_7 = arith.constant 0 : index
    %8 = vector.load %arg4[%c0_6, %c0_7] : memref<128x128xf32, #tpu.memory_space<vmem>>, vector<128x128xf32>
    %cst_8 = arith.constant dense<0.000000e+00> : vector<8x128xf32>
    %9 = tpu.matmul %7, %8, %cst_8 {dimension_numbers = #tpu.dot_dimension_numbers<[1], [0], [0], [1], [0, 0, 1, 1], [], []>} : vector<8x128xf32>, vector<128x128xf32>, vector<8x128xf32> -> vector<8x128xf32>
    %c0_9 = arith.constant 0 : index
    %c0_10 = arith.constant 0 : index
    %10 = vector.load %arg5[%c0_9, %c0_10] : memref<1x128xf32, #tpu.memory_space<vmem>>, vector<1x128xf32>
    %11 = vector.broadcast %10 : vector<1x128xf32> to vector<8x128xf32>
    %12 = arith.addf %9, %11 : vector<8x128xf32>
    %cst_11 = arith.constant 0.000000e+00 : f32
    %13 = vector.broadcast %cst_11 : f32 to vector<8x128xf32>
    %14 = arith.maximumf %12, %13 : vector<8x128xf32>
    %c0_12 = arith.constant 0 : index
    %c0_13 = arith.constant 0 : index
    %15 = vector.load %arg6[%c0_12, %c0_13] : memref<128x128xf32, #tpu.memory_space<vmem>>, vector<128x128xf32>
    %cst_14 = arith.constant dense<0.000000e+00> : vector<8x128xf32>
    %16 = tpu.matmul %14, %15, %cst_14 {dimension_numbers = #tpu.dot_dimension_numbers<[1], [0], [0], [1], [0, 0, 1, 1], [], []>} : vector<8x128xf32>, vector<128x128xf32>, vector<8x128xf32> -> vector<8x128xf32>
    %c0_15 = arith.constant 0 : index
    %c0_16 = arith.constant 0 : index
    %17 = vector.load %arg7[%c0_15, %c0_16] : memref<1x128xf32, #tpu.memory_space<vmem>>, vector<1x128xf32>
    %18 = vector.broadcast %17 : vector<1x128xf32> to vector<8x128xf32>
    %19 = arith.addf %16, %18 : vector<8x128xf32>
    %c0_17 = arith.constant 0 : index
    %c0_18 = arith.constant 0 : index
    %20 = vector.load %arg8[%c0_17, %c0_18] : memref<8x128xf32, #tpu.memory_space<vmem>>, vector<8x128xf32>
    tpu.vector_store %arg8[%c0_17, %c0_18], %19 {strides = array<i32>} : memref<8x128xf32, #tpu.memory_space<vmem>>, vector<8x128xf32>,
    return
  }
  func.func @transform_0(%arg0: i32) -> (i32, i32) {
    %c0_i32 = arith.constant 0 : i32
    %c0_i32_0 = arith.constant 0 : i32
    return %arg0, %c0_i32 : i32, i32
  }
  func.func @transform_1(%arg0: i32) -> (i32, i32) {
    %c0_i32 = arith.constant 0 : i32
    %c0_i32_0 = arith.constant 0 : i32
    %c0_i32_1 = arith.constant 0 : i32
    return %c0_i32, %c0_i32_0 : i32, i32
  }
  func.func @transform_2(%arg0: i32) -> (i32, i32) {
    %c0_i32 = arith.constant 0 : i32
    %c0_i32_0 = arith.constant 0 : i32
    %c0_i32_1 = arith.constant 0 : i32
    return %c0_i32, %c0_i32_0 : i32, i32
  }
  func.func @transform_3(%arg0: i32) -> (i32, i32) {
    %c0_i32 = arith.constant 0 : i32
    %c0_i32_0 = arith.constant 0 : i32
    %c0_i32_1 = arith.constant 0 : i32
    return %c0_i32, %c0_i32_0 : i32, i32
  }
  func.func @transform_4(%arg0: i32) -> (i32, i32) {
    %c0_i32 = arith.constant 0 : i32
    %c0_i32_0 = arith.constant 0 : i32
    %c0_i32_1 = arith.constant 0 : i32
    return %c0_i32, %c0_i32_0 : i32, i32
  }
  func.func @transform_5(%arg0: i32) -> (i32, i32) {
    %c0_i32 = arith.constant 0 : i32
    %c0_i32_0 = arith.constant 0 : i32
    %c0_i32_1 = arith.constant 0 : i32
    return %c0_i32, %c0_i32_0 : i32, i32
  }
  func.func @transform_6(%arg0: i32) -> (i32, i32) {
    %c0_i32 = arith.constant 0 : i32
    %c0_i32_0 = arith.constant 0 : i32
    %c0_i32_1 = arith.constant 0 : i32
    return %c0_i32, %c0_i32_0 : i32, i32
  }
  func.func @transform_7(%arg0: i32) -> (i32, i32) {
    %c0_i32 = arith.constant 0 : i32
    %c0_i32_0 = arith.constant 0 : i32
    return %arg0, %c0_i32 : i32, i32
  }
}

</mosaic_0001>

<bundles_post_ra>
// kernel: noisy_dqn_forward.1
= control target key start
LH: loop header
LB: loop body
LE: loop exit
PB: predicated region body
PF: predicated region fallthrough
CT: control target
= control target key end

     0   :  { %v423_v0 = vmov 0.0   ;;  %vm424_vm0 = vmmov 0   ;;  %vm36_vm1 = vcmask 130048   ;;  %s622_s1 = inlined_call_operand.vmem [shape: f32[16,128], index: 1, kind: input, shape index: {}]   ;;  %s623_s0 = inlined_call_operand.vmem [shape: f32[8,16], index: 0, kind: input, shape index: {}]   ;;  %s624_s3 = inlined_call_operand.vmem [shape: f32[128,128], index: 3, kind: input, shape index: {}]   ;;  %s625_s5 = inlined_call_operand.vmem [shape: f32[128,128], index: 5, kind: input, shape index: {}]   ;;  %s626_s2 = inlined_call_operand.vmem [shape: f32[1,128], index: 2, kind: input, shape index: {}]   ;;  %s627_s4 = inlined_call_operand.vmem [shape: f32[1,128], index: 4, kind: input, shape index: {}]   ;;  %s628_s6 = inlined_call_operand.vmem [shape: f32[1,128], index: 6, kind: input, shape index: {}]   ;;  %s629_s7 = inlined_call_operand.vmem [shape: f32[8,128], index: 7, kind: output, shape index: {}]  }
   0x1   :  { %344 = vmatprep.subr.mxu0 %v423_v0  ;;  %v28_v1 = vld [vmem:[%s622_s1 + $0x8] sm:$0xff]  ;;  %v27_v2 = vld [vmem:[%s622_s1] sm:$0xff]  ;;  %348 = vmatprep.mubr.msk.f32.mxu0 %vm424_vm0, %v423_v0  ;;  %v126_v4 = vld [vmem:[%s624_s3 + $0x78] sm:$0xff] }
   0x2   :  { %345 = vmatpush3.msra.mxu0 %v28_v1  ;;  %v26_v3 = vld [vmem:[%s623_s0] sm:$0xff]  ;;  %351 = vmatprep.subr.mxu1 %v423_v0  ;;  %v125_v5 = vld [vmem:[%s624_s3 + $0x70] sm:$0xff]  ;;  %v124_v6 = vld [vmem:[%s624_s3 + $0x68] sm:$0xff] }
   0x3   :  { %346 = vmatprep.subr.mxu0 %v423_v0  ;;  %352 = vmatpush3.msra.mxu1 %v126_v4  ;;  %v123_v7 = vld [vmem:[%s624_s3 + $0x60] sm:$0xff]  ;;  %v122_v8 = vld [vmem:[%s624_s3 + $0x58] sm:$0xff]  ;;  %v121_v9 = vld [vmem:[%s624_s3 + $0x50] sm:$0xff] }
   0x4   :  { %347 = vmatpush3.msra.mxu0 %v27_v2  ;;  %353 = vmatprep.subr.mxu1 %v423_v0  ;;  %v120_v10 = vld [vmem:[%s624_s3 + $0x48] sm:$0xff]  ;;  %v119_v11 = vld [vmem:[%s624_s3 + $0x40] sm:$0xff]  ;;  %v118_v12 = vld [vmem:[%s624_s3 + $0x38] sm:$0xff] }
   0x5   :  { %349 = vmatmul.mubr.msk.f32.vlgmr.msra.gmra.mxu0 %vm36_vm1, %v26_v3  ;;  %354 = vmatpush3.msra.mxu1 %v125_v5  ;;  %v117_v13 = vld [vmem:[%s624_s3 + $0x30] sm:$0xff]  ;;  %v116_v14 = vld [vmem:[%s624_s3 + $0x28] sm:$0xff]  ;;  %v115_v15 = vld [vmem:[%s624_s3 + $0x20] sm:$0xff] }
   0x6   :  { %355 = vmatprep.subr.mxu1 %v423_v0  ;;  %383 = vmatprep.mubr.msk.f32.mxu1 %vm424_vm0, %v423_v0  ;;  %v114_v16 = vld [vmem:[%s624_s3 + $0x18] sm:$0xff]  ;;  %v113_v17 = vld [vmem:[%s624_s3 + $0x10] sm:$0xff]  ;;  %v112_v18 = vld [vmem:[%s624_s3 + $0x8] sm:$0xff] }
   0x7   :  { %356 = vmatpush3.msra.mxu1 %v124_v6  ;;  %386 = vmatprep.subr.mxu0 %v423_v0  ;;  %v111_v19 = vld [vmem:[%s624_s3] sm:$0xff]  ;;  %v220_v20 = vld [vmem:[%s625_s5 + $0x78] sm:$0xff]  ;;  %v219_v21 = vld [vmem:[%s625_s5 + $0x70] sm:$0xff] }
   0x8   :  { %357 = vmatprep.subr.mxu1 %v423_v0  ;;  %418 = vmatprep.mubr.msk.f32.mxu0 %vm424_vm0, %v423_v0  ;;  %v218_v22 = vld [vmem:[%s625_s5 + $0x68] sm:$0xff]  ;;  %v217_v23 = vld [vmem:[%s625_s5 + $0x60] sm:$0xff]  ;;  %v216_v24 = vld [vmem:[%s625_s5 + $0x58] sm:$0xff] }
   0x9   :  { %358 = vmatpush3.msra.mxu1 %v123_v7  ;;  %387 = vmatpush3.msra.mxu0 %v220_v20  ;;  %v215_v25 = vld [vmem:[%s625_s5 + $0x50] sm:$0xff]  ;;  %v214_v26 = vld [vmem:[%s625_s5 + $0x48] sm:$0xff]  ;;  %v213_v27 = vld [vmem:[%s625_s5 + $0x40] sm:$0xff] }
   0xa   :  { %359 = vmatprep.subr.mxu1 %v423_v0  ;;  %388 = vmatprep.subr.mxu0 %v423_v0  ;;  %v212_v28 = vld [vmem:[%s625_s5 + $0x38] sm:$0xff]  ;;  %v211_v29 = vld [vmem:[%s625_s5 + $0x30] sm:$0xff]  ;;  %v210_v30 = vld [vmem:[%s625_s5 + $0x28] sm:$0xff] }
   0xb   :  { %360 = vmatpush3.msra.mxu1 %v122_v8  ;;  %389 = vmatpush3.msra.mxu0 %v219_v21  ;;  %v209_v31 = vld [vmem:[%s625_s5 + $0x20] sm:$0xff]  ;;  %v208_v32 = vld [vmem:[%s625_s5 + $0x18] sm:$0xff]  ;;  %v207_v38 = vld [vmem:[%s625_s5 + $0x10] sm:$0xff] }
   0xc   :  { %361 = vmatprep.subr.mxu1 %v423_v0  ;;  %390 = vmatprep.subr.mxu0 %v423_v0  ;;  %v303_v33 = vld [vmem:[%s626_s2] ss:$0 sm:$0xff]  ;;  %v206_v39 = vld [vmem:[%s625_s5 + $0x8] sm:$0xff] }
   0xd   :  { %362 = vmatpush3.msra.mxu1 %v121_v9  ;;  %391 = vmatpush3.msra.mxu0 %v218_v22  ;;  %v205_v40 = vld [vmem:[%s625_s5] sm:$0xff] }
   0xe   :  { %363 = vmatprep.subr.mxu1 %v423_v0  ;;  %392 = vmatprep.subr.mxu0 %v423_v0  ;;  %v305_v41 = vld [vmem:[%s627_s4] ss:$0 sm:$0xff] }
   0xf   :  { %364 = vmatpush3.msra.mxu1 %v120_v10  ;;  %393 = vmatpush3.msra.mxu0 %v217_v23  ;;  %v306_v46 = vld [vmem:[%s628_s6] ss:$0 sm:$0xff] }
  0x10   :  { %365 = vmatprep.subr.mxu1 %v423_v0  ;;  %394 = vmatprep.subr.mxu0 %v423_v0 }
  0x11   :  { %366 = vmatpush3.msra.mxu1 %v119_v11  ;;  %395 = vmatpush3.msra.mxu0 %v216_v24 }
  0x12   :  { %367 = vmatprep.subr.mxu1 %v423_v0  ;;  %396 = vmatprep.subr.mxu0 %v423_v0 }
  0x13   :  { %368 = vmatpush3.msra.mxu1 %v118_v12  ;;  %397 = vmatpush3.msra.mxu0 %v215_v25 }
  0x14   :  { %369 = vmatprep.subr.mxu1 %v423_v0  ;;  %398 = vmatprep.subr.mxu0 %v423_v0 }
  0x15   :  { %370 = vmatpush3.msra.mxu1 %v117_v13  ;;  %399 = vmatpush3.msra.mxu0 %v214_v26 }
  0x16   :  { %371 = vmatprep.subr.mxu1 %v423_v0  ;;  %400 = vmatprep.subr.mxu0 %v423_v0 }
  0x17   :  { %372 = vmatpush3.msra.mxu1 %v116_v14  ;;  %401 = vmatpush3.msra.mxu0 %v213_v27 }
  0x18   :  { %373 = vmatprep.subr.mxu1 %v423_v0  ;;  %402 = vmatprep.subr.mxu0 %v423_v0 }
  0x19   :  { %374 = vmatpush3.msra.mxu1 %v115_v15  ;;  %403 = vmatpush3.msra.mxu0 %v212_v28 }
  0x1a   :  { %375 = vmatprep.subr.mxu1 %v423_v0  ;;  %404 = vmatprep.subr.mxu0 %v423_v0 }
  0x1b   :  { %376 = vmatpush3.msra.mxu1 %v114_v16  ;;  %405 = vmatpush3.msra.mxu0 %v211_v29 }
  0x1c   :  { %377 = vmatprep.subr.mxu1 %v423_v0  ;;  %406 = vmatprep.subr.mxu0 %v423_v0 }
  0x1d   :  { %378 = vmatpush3.msra.mxu1 %v113_v17  ;;  %407 = vmatpush3.msra.mxu0 %v210_v30 }
  0x1e   :  { %379 = vmatprep.subr.mxu1 %v423_v0  ;;  %408 = vmatprep.subr.mxu0 %v423_v0 }
  0x1f   :  { %380 = vmatpush3.msra.mxu1 %v112_v18  ;;  %409 = vmatpush3.msra.mxu0 %v209_v31 }
  0x20   :  { %381 = vmatprep.subr.mxu1 %v423_v0  ;;  %410 = vmatprep.subr.mxu0 %v423_v0 }
  0x21   :  { %382 = vmatpush3.msra.mxu1 %v111_v19  ;;  %411 = vmatpush3.msra.mxu0 %v208_v32 }
  0x22   :  { %412 = vmatprep.subr.mxu0 %v423_v0 }
  0x23   :  { %413 = vmatpush3.msra.mxu0 %v207_v38 }
  0x24   :  { %414 = vmatprep.subr.mxu0 %v423_v0 }
  0x25   :  { %415 = vmatpush3.msra.mxu0 %v206_v39 }
  0x26   :  { %416 = vmatprep.subr.mxu0 %v423_v0 }
  0x27   :  { %417 = vmatpush3.msra.mxu0 %v205_v40 }
  0xc5   :  { %v106_v34 = vpop.f32.mrf.mxu0 }
  0xc6   :  { %v107_v35 = vadd.f32 %v303_v33, %v106_v34 }
  0xc7   :  { %v350_v36 = vpop.f32.mrf.mxu0 }
  0xc8   :  { %v110_v37 = vmax.f32 %v107_v35, 0.0 }
  0xca   :  { %384 = vmatmul.mubr.f32.vlgmr.msra.gmra.mxu1 %v110_v37 }
 0x18a   :  { %v200_v42 = vpop.f32.mrf.mxu1 }
 0x18b   :  { %v201_v43 = vadd.f32 %v305_v41, %v200_v42 }
 0x18c   :  { %v385_v44 = vpop.f32.mrf.mxu1 }
 0x18d   :  { %v204_v45 = vmax.f32 %v201_v43, 0.0 }
 0x18f   :  { %419 = vmatmul.mubr.f32.vlgmr.msra.gmra.mxu0 %v204_v45 }
 0x24f   :  { %v294_v47 = vpop.f32.mrf.mxu0 }
 0x250   :  { %v295_v48 = vadd.f32 %v306_v46, %v294_v47 }
 0x251   :  { %v420_v49 = vpop.f32.mrf.mxu0 }
 0x252   :  { %298 = vst [vmem:[%s629_s7] sm:$0xff] %v295_v48 }

</bundles_post_ra>
